<compile_context>
chip_gen: v6e
topology: v6e:2x2x1
jax: 0.10.0
libtpu: 0.0.40
codegen_flags: <defaults>
</compile_context>

<pallas_src>
import functools

import jax
import jax.numpy as jnp
from jax.experimental import pallas as pl
from jax.experimental.pallas import tpu as pltpu

LANES = 128                  # TPU vreg lane width; edge-kernel last dim = multiple of this
_MAX_EDGE_TILE_ROWS = 2048   # edge tile = (rows, 128) f32 -> 1 MiB per operand
_MAX_NODE_TILE = 1024


def _round_up(x, m):
    return ((x + m - 1) // m) * m


# ---------------------------------------------------------------------------
# Kernel 1: per-node partial scores
#   s[n, 0] = z[n, :] . w_a + b_fused     (src half, bias folded in)
#   s[n, 1] = z[n, :] . w_b               (dst half)
# ---------------------------------------------------------------------------
def _node_score_kernel(z_ref, w_ref, b_ref, s_ref):
    # z_ref: [tile_n, D]   w_ref: [D, 2]   b_ref: [1, 2]   s_ref: [tile_n, 2]
    s_ref[...] = (
        jnp.dot(z_ref[...], w_ref[...], preferred_element_type=jnp.float32)
        + b_ref[...]
    )


def _node_scores(z, w_node, bias2, *, max_tile=_MAX_NODE_TILE):
    N, D = z.shape
    tile_n = min(max_tile, _round_up(N, 8))
    n_pad = _round_up(N, tile_n)
    if n_pad != N:
        z = jnp.pad(z, ((0, n_pad - N), (0, 0)))
    s = pl.pallas_call(
        _node_score_kernel,
        out_shape=jax.ShapeDtypeStruct((n_pad, 2), jnp.float32),
        grid=(n_pad // tile_n,),
        in_specs=[
            pl.BlockSpec((tile_n, D), lambda i: (i, 0)),   # z tile
            pl.BlockSpec((D, 2), lambda i: (0, 0)),        # fused weights (resident)
            pl.BlockSpec((1, 2), lambda i: (0, 0)),        # fused bias row
        ],
        out_specs=pl.BlockSpec((tile_n, 2), lambda i: (i, 0)),
        compiler_params=pltpu.CompilerParams(
            dimension_semantics=("parallel",)),
    )(z, w_node, bias2)
    return s[:N]


# ---------------------------------------------------------------------------
# Kernel 2: lane-dense per-edge combine
#   out = [sigmoid](src_score + dst_score)        (bias already inside src_score)
# ---------------------------------------------------------------------------
def _edge_score_kernel(a_ref, b_ref, o_ref, *, sigmoid):
    v = a_ref[...] + b_ref[...]
    if sigmoid:
        v = jax.nn.sigmoid(v)
    o_ref[...] = v


def link_predictor_forward(z, edge_index, params, *, sigmoid=False,
                           max_edge_tile_rows=_MAX_EDGE_TILE_ROWS):
    """Pallas implementation of LinkPredictor.forward.

    z          : [N, D] float32 node embeddings
    edge_index : [2, E] int32 edge endpoints
    params     : dict with w1 [C, C] (in,out), b1 [C], w2 [C, 1], b2 [1], C = 2*D
    """
    src = edge_index[0]
    dst = edge_index[1]
    N, D = z.shape

    w1 = params["w1"]            # [C, C]  stored as [in, out]
    b1 = params["b1"]            # [C]
    w2 = params["w2"]            # [C, 1]  stored as [in, out]
    b2 = params["b2"]            # [1]

    # Exact algebraic fold of lin_2 o lin_1 (parameter preprocessing, O(C^2)).
    w_fused = w1 @ w2                                   # [C, 1]
    b_fused = (b1 @ w2)[0] + b2[0]                      # scalar
    w_node = jnp.concatenate([w_fused[:D], w_fused[D:]], axis=1)        # [D, 2]
    bias2 = jnp.stack([b_fused, jnp.zeros_like(b_fused)]).reshape(1, 2)  # [1, 2]

    # Kernel 1: per-node partial scores (bias folded into the src column).
    s = _node_scores(z, w_node, bias2)                  # [N, 2]

    # Pure indexing glue (same role as z[edge_index[0]] in the PyTorch forward).
    src_s = jnp.take(s[:, 0], src, axis=0)              # [E]
    dst_s = jnp.take(s[:, 1], dst, axis=0)              # [E]
    E = int(src_s.shape[0])

    # Lane-dense [rows, 128] layout for the edge kernel.
    rows = (E + LANES - 1) // LANES
    tile_r = min(max_edge_tile_rows, _round_up(rows, 8))
    rows_pad = _round_up(rows, tile_r)
    e_pad = rows_pad * LANES
    src_s = jnp.pad(src_s, (0, e_pad - E)).reshape(rows_pad, LANES)
    dst_s = jnp.pad(dst_s, (0, e_pad - E)).reshape(rows_pad, LANES)

    kernel = functools.partial(_edge_score_kernel, sigmoid=sigmoid)
    out = pl.pallas_call(
        kernel,
        out_shape=jax.ShapeDtypeStruct((rows_pad, LANES), jnp.float32),
        grid=(rows_pad // tile_r,),
        in_specs=[
            pl.BlockSpec((tile_r, LANES), lambda i: (i, 0)),
            pl.BlockSpec((tile_r, LANES), lambda i: (i, 0)),
        ],
        out_specs=pl.BlockSpec((tile_r, LANES), lambda i: (i, 0)),
        compiler_params=pltpu.CompilerParams(
            dimension_semantics=("parallel",)),
    )(src_s, dst_s)

    # Padded tail rows are garbage-free filler; slice back to [E, 1].
    return out.reshape(-1)[:E].reshape(E, 1)


def init_params(key, in_channels):
    """Deterministic init matching torch.nn.Linear default (U[-1/sqrt(fan_in), +])."""
    k1, k2, k3, k4 = jax.random.split(key, 4)
    bound1 = 1.0 / jnp.sqrt(in_channels)
    w1 = jax.random.uniform(k1, (in_channels, in_channels), jnp.float32,
                            minval=-bound1, maxval=bound1)   # stored as [in, out]
    b1 = jax.random.uniform(k2, (in_channels,), jnp.float32,
                            minval=-bound1, maxval=bound1)
    w2 = jax.random.uniform(k3, (in_channels, 1), jnp.float32,
                            minval=-bound1, maxval=bound1)   # stored as [in, out]
    b2 = jax.random.uniform(k4, (1,), jnp.float32,
                            minval=-bound1, maxval=bound1)
    return {"w1": w1, "b1": b1, "w2": w2, "b2": b2}


def _reference_forward(z, edge_index, params, sigmoid=False):
    e = jnp.concatenate([z[edge_index[0]], z[edge_index[1]]], axis=1)
    h = e @ params["w1"] + params["b1"]
    v = h @ params["w2"] + params["b2"]
    return jax.nn.sigmoid(v) if sigmoid else v


if __name__ == "__main__":
    key = jax.random.PRNGKey(0)
    k_z, k_e, k_p = jax.random.split(key, 3)

    N = 64          # number of nodes
    D = 16          # node embedding dim
    C = 2 * D       # in_channels of LinkPredictor (concat of two node embeddings)
    E = 200         # number of edges (non-multiple of 128 to exercise padding)

    z = jax.random.normal(k_z, (N, D), dtype=jnp.float32)
    edge_index = jax.random.randint(k_e, (2, E), 0, N, dtype=jnp.int32)
    params = init_params(k_p, C)

    out = link_predictor_forward(z, edge_index, params, sigmoid=False)
    out = jax.block_until_ready(out)

    ref = _reference_forward(z, edge_index, params, sigmoid=False)
    assert out.shape == (E, 1)
    # Algebraic fold reassociates FP ops -> allow ~1e-5-level differences.
    assert jnp.allclose(out, ref, atol=1e-4, rtol=1e-4), "mismatch vs reference"

    # Also exercise the sigmoid=True path once.
    out_sig = jax.block_until_ready(
        link_predictor_forward(z, edge_index, params, sigmoid=True))
    ref_sig = _reference_forward(z, edge_index, params, sigmoid=True)
    assert jnp.allclose(out_sig, ref_sig, atol=1e-4, rtol=1e-4)

    print("KERNEL_OK")
</pallas_src>

<mosaic_0001>
module attributes {stable_mosaic.version = 11 : i64} {
  func.func @_node_score_kernel(%arg0: i32, %arg1: memref<64x16xf32, #tpu.memory_space<vmem>>, %arg2: memref<16x2xf32, #tpu.memory_space<vmem>>, %arg3: memref<1x2xf32, #tpu.memory_space<vmem>>, %arg4: memref<64x2xf32, #tpu.memory_space<vmem>>) attributes {dimension_semantics = [#tpu.dimension_semantics<parallel>], iteration_bounds = array<i64: 1>, scalar_prefetch = 0 : i64, scratch_operands = 0 : i64, tpu.core_type = #tpu.core_type<tc>, window_params = [{transform_indices = @transform_0, window_bounds = array<i64: 64, 16>}, {pipeline_mode = #tpu.pipeline_mode<synchronous>, transform_indices = @transform_1, window_bounds = array<i64: 16, 2>}, {pipeline_mode = #tpu.pipeline_mode<synchronous>, transform_indices = @transform_2, window_bounds = array<i64: 1, 2>}, {transform_indices = @transform_3, window_bounds = array<i64: 64, 2>}]} {
    %c0 = arith.constant 0 : index
    %c0_0 = arith.constant 0 : index
    %0 = vector.load %arg1[%c0, %c0_0] : memref<64x16xf32, #tpu.memory_space<vmem>>, vector<64x16xf32>
    %c0_1 = arith.constant 0 : index
    %c0_2 = arith.constant 0 : index
    %1 = vector.load %arg2[%c0_1, %c0_2] : memref<16x2xf32, #tpu.memory_space<vmem>>, vector<16x2xf32>
    %cst = arith.constant dense<0.000000e+00> : vector<64x2xf32>
    %2 = tpu.matmul %0, %1, %cst {dimension_numbers = #tpu.dot_dimension_numbers<[1], [0], [0], [1], [0, 0, 1, 1], [], []>} : vector<64x16xf32>, vector<16x2xf32>, vector<64x2xf32> -> vector<64x2xf32>
    %c0_3 = arith.constant 0 : index
    %c0_4 = arith.constant 0 : index
    %3 = vector.load %arg3[%c0_3, %c0_4] : memref<1x2xf32, #tpu.memory_space<vmem>>, vector<1x2xf32>
    %4 = vector.broadcast %3 : vector<1x2xf32> to vector<64x2xf32>
    %5 = arith.addf %2, %4 : vector<64x2xf32>
    %c0_5 = arith.constant 0 : index
    %c0_6 = arith.constant 0 : index
    %6 = vector.load %arg4[%c0_5, %c0_6] : memref<64x2xf32, #tpu.memory_space<vmem>>, vector<64x2xf32>
    tpu.vector_store %arg4[%c0_5, %c0_6], %5 {strides = array<i32>} : memref<64x2xf32, #tpu.memory_space<vmem>>, vector<64x2xf32>,
    return
  }
  func.func @transform_0(%arg0: i32) -> (i32, i32) {
    %c0_i32 = arith.constant 0 : i32
    %c0_i32_0 = arith.constant 0 : i32
    return %arg0, %c0_i32 : i32, i32
  }
  func.func @transform_1(%arg0: i32) -> (i32, i32) {
    %c0_i32 = arith.constant 0 : i32
    %c0_i32_0 = arith.constant 0 : i32
    %c0_i32_1 = arith.constant 0 : i32
    return %c0_i32, %c0_i32_0 : i32, i32
  }
  func.func @transform_2(%arg0: i32) -> (i32, i32) {
    %c0_i32 = arith.constant 0 : i32
    %c0_i32_0 = arith.constant 0 : i32
    %c0_i32_1 = arith.constant 0 : i32
    return %c0_i32, %c0_i32_0 : i32, i32
  }
  func.func @transform_3(%arg0: i32) -> (i32, i32) {
    %c0_i32 = arith.constant 0 : i32
    %c0_i32_0 = arith.constant 0 : i32
    return %arg0, %c0_i32 : i32, i32
  }
}

</mosaic_0001>

<bundles_post_ra>
// kernel: tpu_custom_call.1
= control target key start
LH: loop header
LB: loop body
LE: loop exit
PB: predicated region body
PF: predicated region fallthrough
CT: control target
= control target key end

     0   :  { %vm31_vm0 = vcmask 130048   ;;  %vm161_vm1 = vcmask 15360   ;;  %s306_s1 = inlined_call_operand.vmem [shape: f32[16,2], index: 1, kind: input, shape index: {}]   ;;  %s307_s0 = inlined_call_operand.vmem [shape: f32[64,16], index: 0, kind: input, shape index: {}]   ;;  %s308_s2 = inlined_call_operand.vmem [shape: f32[1,2], index: 2, kind: input, shape index: {}]   ;;  %s309_s3 = inlined_call_operand.vmem [shape: f32[64,2], index: 3, kind: output, shape index: {}]  }
   0x1   :  { %v23_v0 = vld [vmem:[%s306_s1 + $0x8] sm:$0xff]  ;;  %v22_v1 = vld [vmem:[%s306_s1] sm:$0xff]  ;;  %v16_v6 = vld [vmem:[%s307_s0 + $0x10] sm:$0xff] }
   0x2   :  { %193 = vmatprep.subr.mxu0 %v23_v0  ;;  %209 = vmatprep.subr.mxu1 %v23_v0  ;;  %v14_v2 = vld [vmem:[%s307_s0] sm:$0xff]  ;;  %v15_v4 = vld [vmem:[%s307_s0 + $0x8] sm:$0xff]  ;;  %v20_v7 = vld [vmem:[%s307_s0 + $0x30] sm:$0xff] }
   0x3   :  { %194 = vmatpush3.msra.mxu0 %v23_v0  ;;  %211 = vmatpush3.msra.mxu1 %v23_v0  ;;  %v18_v3 = vld [vmem:[%s307_s0 + $0x20] sm:$0xff]  ;;  %v19_v5 = vld [vmem:[%s307_s0 + $0x28] sm:$0xff]  ;;  %v17_v8 = vld [vmem:[%s307_s0 + $0x18] sm:$0xff] }
   0x4   :  { %195 = vmatprep.subr.mxu0 %v22_v1  ;;  %210 = vmatprep.subr.mxu1 %v22_v1  ;;  %v21_v9 = vld [vmem:[%s307_s0 + $0x38] sm:$0xff]  ;;  %v174_v10 = vld [vmem:[%s308_s2] ss:$0 sm:$0xff] }
   0x5   :  { %196 = vmatpush3.msra.mxu0 %v22_v1  ;;  %212 = vmatpush3.msra.mxu1 %v22_v1 }
   0x6   :  { %197 = vmatprep.mubr.msk.f32.mxu0 %vm31_vm0, %v14_v2  ;;  %203 = vmatprep.mubr.msk.f32.mxu1 %vm31_vm0, %v18_v3 }
   0x7   :  { %198 = vmatmul.mubr.msk.f32.vlgmr.msra.gmra.mxu0 %vm31_vm0, %v15_v4  ;;  %204 = vmatmul.mubr.msk.f32.vlgmr.msra.gmra.mxu1 %vm31_vm0, %v19_v5 }
   0x8   :  { %200 = vmatprep.mubr.msk.f32.mxu0 %vm31_vm0, %v16_v6  ;;  %206 = vmatprep.mubr.msk.f32.mxu1 %vm31_vm0, %v20_v7 }
   0xb   :  { %201 = vmatmul.mubr.msk.f32.gmra.mxu0 %vm31_vm0, %v17_v8  ;;  %207 = vmatmul.mubr.msk.f32.gmra.mxu1 %vm31_vm0, %v21_v9 }
  0xc7   :  { %v199_v11 = vpop.f32.mrf.mxu0  ;;  %v205_v12 = vpop.f32.mrf.mxu1 }
  0xc8   :  { %v128_v13 = vadd.f32 %v199_v11, %v174_v10  ;;  %v148_v14 = vadd.f32 %v205_v12, %v174_v10 }
  0xc9   :  { %v122_v15 = vpop.f32.mrf.mxu0  ;;  %v142_v16 = vpop.f32.mrf.mxu1 }
  0xca   :  { %163 = vst.msk [vmem:[%s309_s3 + $0x8] sm:$0xff] %vm161_vm1, %v128_v13  ;;  %167 = vst.msk [vmem:[%s309_s3 + $0x28] sm:$0xff] %vm161_vm1, %v148_v14  ;;  %v123_v17 = vadd.f32 %v174_v10, %v122_v15  ;;  %v143_v18 = vadd.f32 %v174_v10, %v142_v16 }
  0xcb   :  { %v202_v19 = vpop.f32.mrf.mxu0  ;;  %v208_v20 = vpop.f32.mrf.mxu1 }
  0xcc   :  { %162 = vst.msk [vmem:[%s309_s3] sm:$0xff] %vm161_vm1, %v123_v17  ;;  %166 = vst.msk [vmem:[%s309_s3 + $0x20] sm:$0xff] %vm161_vm1, %v143_v18  ;;  %v138_v21 = vadd.f32 %v202_v19, %v174_v10  ;;  %v158_v22 = vadd.f32 %v208_v20, %v174_v10 }
  0xcd   :  { %v132_v23 = vpop.f32.mrf.mxu0  ;;  %v152_v24 = vpop.f32.mrf.mxu1 }
  0xce   :  { %165 = vst.msk [vmem:[%s309_s3 + $0x18] sm:$0xff] %vm161_vm1, %v138_v21  ;;  %169 = vst.msk [vmem:[%s309_s3 + $0x38] sm:$0xff] %vm161_vm1, %v158_v22  ;;  %v133_v25 = vadd.f32 %v174_v10, %v132_v23  ;;  %v153_v26 = vadd.f32 %v174_v10, %v152_v24 }
  0xd0   :  { %164 = vst.msk [vmem:[%s309_s3 + $0x10] sm:$0xff] %vm161_vm1, %v133_v25  ;;  %168 = vst.msk [vmem:[%s309_s3 + $0x30] sm:$0xff] %vm161_vm1, %v153_v26 }

</bundles_post_ra>
